<compile_context>
chip_gen: v7x
topology: tpu7x:2x2x1
jax: 0.10.0
libtpu: 0.0.40
codegen_flags: <defaults>
</compile_context>

<pallas_src>
import functools

import jax
import jax.numpy as jnp
from jax.experimental import pallas as pl
from jax.experimental.pallas import tpu as pltpu

BN_EPS = 1e-5
HIDDEN = 64
SLAB_COLS = 8  # [w1_eff, b1_eff, b2, w3, b3, pad, pad, pad]


def squarenet_kernel(x_ref, w2_ref, slab_ref, o_ref):
    """One batch tile; the batch lives on the lane axis.

    x_ref    : VMEM (1, TILE_N)  f32   one scalar feature per sample
    w2_ref   : VMEM (64, 64)     bf16  Linear(64,64).weight, PyTorch (out,in) layout
    slab_ref : VMEM (64, 8)      f32   packed rank-1 params (BN already folded in)
    o_ref    : VMEM (1, TILE_N)  f32   lane-dense output row
    """
    x = x_ref[...]                      # (1, T)
    w1 = slab_ref[:, 0:1]               # (64, 1)  w1 * inv_std
    b1 = slab_ref[:, 1:2]               # (64, 1)  b1 - w1 * mean * inv_std
    b2 = slab_ref[:, 2:3]               # (64, 1)
    w3 = slab_ref[:, 3:4]               # (64, 1)
    b3 = slab_ref[0:1, 4:5]             # (1, 1)

    # Layer 1 (+ folded BatchNorm): K == 1 -> VPU broadcast outer product, no MXU.
    h1 = jnp.maximum(w1 * x + b1, 0.0)                               # (64, T) f32

    # Layer 2: the only real matmul. bf16 operands, f32 accumulate on the MXU.
    h2 = jnp.dot(w2_ref[...], h1.astype(jnp.bfloat16),
                 preferred_element_type=jnp.float32) + b2            # (64, T) f32
    h2 = jnp.maximum(h2, 0.0)

    # Layer 3: N_out == 1 -> VPU multiply + sublane (XLU) reduce; result is already
    # a lane-dense (1, T) row, so full tiles store unmasked.
    o_ref[...] = jnp.sum(w3 * h2, axis=0, keepdims=True) + b3


def _auto_tile(n):
    """>= 2 tiles (v7x megacore), multiple of 256 lanes, capped at 2048."""
    t = pl.cdiv(pl.cdiv(n, 2), 256) * 256
    return int(max(256, min(2048, t)))


@functools.partial(jax.jit, static_argnames=("tile_n",))
def squarenet_forward(x, params, *, tile_n=None):
    """x: (N, 1) float32 -> (N, 1) float32, SquareNet.forward (training-mode BN)."""
    n = x.shape[0]
    if tile_n is None:
        tile_n = _auto_tile(n)

    x_row = x.reshape(1, n).astype(jnp.float32)

    # Single-pass global batch statistics (biased variance, eps like PyTorch).
    s = jnp.sum(x_row)
    ss = jnp.sum(jnp.square(x_row))
    mean = s / n
    var = jnp.maximum(ss / n - mean * mean, 0.0)
    inv_std = jax.lax.rsqrt(var + BN_EPS)

    # Fold BatchNorm into layer 1 (computed once in XLA on (64,1) tensors).
    w1 = params["w1"].astype(jnp.float32)            # (64, 1)
    b1 = params["b1"].astype(jnp.float32)            # (64, 1)
    w1_eff = w1 * inv_std
    b1_eff = b1 - w1 * (mean * inv_std)

    b3_col = jnp.broadcast_to(params["b3"].reshape(1, 1).astype(jnp.float32),
                              (HIDDEN, 1))
    pad = jnp.zeros((HIDDEN, SLAB_COLS - 5), jnp.float32)
    slab = jnp.concatenate(
        [w1_eff, b1_eff,
         params["b2"].astype(jnp.float32),
         params["w3"].astype(jnp.float32),
         b3_col, pad], axis=1)                       # (64, 8) f32

    w2_bf16 = params["w2"].astype(jnp.bfloat16)      # pre-cast once for the MXU

    n_tiles = pl.cdiv(n, tile_n)
    const = lambda i: (0, 0)  # weights stay resident in VMEM across all grid steps

    out_row = pl.pallas_call(
        squarenet_kernel,
        out_shape=jax.ShapeDtypeStruct((1, n), jnp.float32),
        grid=(n_tiles,),
        in_specs=[
            pl.BlockSpec((1, tile_n), lambda i: (0, i)),       # x tile (lane-dense)
            pl.BlockSpec((HIDDEN, HIDDEN), const),             # w2 (bf16)
            pl.BlockSpec((HIDDEN, SLAB_COLS), const),          # packed rank-1 params
        ],
        out_specs=pl.BlockSpec((1, tile_n), lambda i: (0, i)),
        compiler_params=pltpu.CompilerParams(
            dimension_semantics=("parallel",),                 # v7x: shard tiles over 2 TCs
        ),
    )(x_row, w2_bf16, slab)

    return out_row.reshape(n, 1)


def init_params(key):
    """PyTorch-style shapes/init, kept in layouts that suit the batch-on-lanes
    kernel: rank-1 weights/biases as (64,1) columns, the 64x64 weight in
    PyTorch's native (out, in) layout (kernel computes W2 @ h1)."""
    k1, k2, k3, k4, k5, k6 = jax.random.split(key, 6)

    def uniform(k, shape, fan_in):
        bound = 1.0 / jnp.sqrt(jnp.float32(fan_in))
        return jax.random.uniform(k, shape, jnp.float32, -bound, bound)

    return {
        "w1": uniform(k1, (HIDDEN, 1), 1),            # Linear(1,64).weight  (64,1)
        "b1": uniform(k2, (HIDDEN, 1), 1),            # Linear(1,64).bias
        "w2": uniform(k3, (HIDDEN, HIDDEN), HIDDEN),  # Linear(64,64).weight (out,in)
        "b2": uniform(k4, (HIDDEN, 1), HIDDEN),       # Linear(64,64).bias
        "w3": uniform(k5, (HIDDEN, 1), HIDDEN),       # Linear(64,1).weight  -> (64,1)
        "b3": uniform(k6, (1,), HIDDEN),              # Linear(64,1).bias
    }


def reference_forward(x, params):
    """Pure-JAX f32 reference with PyTorch forward semantics (training-mode BN)."""
    x = x.astype(jnp.float32)
    mean = jnp.mean(x, axis=0, keepdims=True)
    var = jnp.mean((x - mean) ** 2, axis=0, keepdims=True)
    xn = (x - mean) / jnp.sqrt(var + BN_EPS)
    h1 = jnp.maximum(xn @ params["w1"].T + params["b1"].T, 0.0)
    h2 = jnp.maximum(h1 @ params["w2"].T + params["b2"].T, 0.0)
    return h2 @ params["w3"] + params["b3"].reshape(1, 1)


# TODO(synk): BatchNorm1d running_mean/running_var buffer updates (a training-time
# side effect of the PyTorch forward) are not modeled; only the output is computed.

if __name__ == "__main__":
    key = jax.random.PRNGKey(0)
    kx, kp = jax.random.split(key)

    N = 1000  # not a tile multiple -> exercises the ragged last block + 2-tile grid
    x = jax.random.normal(kx, (N, 1), dtype=jnp.float32)
    params = init_params(kp)

    out = squarenet_forward(x, params)           # auto tile: 512 lanes, 2 tiles
    out = jax.block_until_ready(out)

    ref = reference_forward(x, params)
    assert out.shape == (N, 1), out.shape
    max_err = float(jnp.max(jnp.abs(out - ref)))
    # bf16 MXU inputs (f32 accumulate) -> tolerance loosened vs. the pure-f32 path.
    assert jnp.allclose(out, ref, atol=5e-2, rtol=5e-2), max_err

    print("KERNEL_OK")
</pallas_src>

<mosaic_0001>
module attributes {stable_mosaic.version = 11 : i64} {
  func.func @squarenet_kernel(%arg0: i32, %arg1: memref<1x512xf32, #tpu.memory_space<vmem>>, %arg2: memref<64x64xbf16, #tpu.memory_space<vmem>>, %arg3: memref<64x8xf32, #tpu.memory_space<vmem>>, %arg4: memref<1x512xf32, #tpu.memory_space<vmem>>) attributes {dimension_semantics = [#tpu.dimension_semantics<parallel>], iteration_bounds = array<i64: 2>, scalar_prefetch = 0 : i64, scratch_operands = 0 : i64, tpu.core_type = #tpu.core_type<tc>, window_params = [{transform_indices = @transform_0, window_bounds = array<i64: 1, 512>}, {pipeline_mode = #tpu.pipeline_mode<synchronous>, transform_indices = @transform_1, window_bounds = array<i64: 64, 64>}, {pipeline_mode = #tpu.pipeline_mode<synchronous>, transform_indices = @transform_2, window_bounds = array<i64: 64, 8>}, {transform_indices = @transform_3, window_bounds = array<i64: 1, 512>}]} {
    %c0 = arith.constant 0 : index
    %c0_0 = arith.constant 0 : index
    %0 = vector.load %arg1[%c0, %c0_0] : memref<1x512xf32, #tpu.memory_space<vmem>>, vector<1x512xf32>
    %c0_1 = arith.constant 0 : index
    %c0_2 = arith.constant 0 : index
    %1 = vector.load %arg3[%c0_1, %c0_2] : memref<64x8xf32, #tpu.memory_space<vmem>>, vector<64x1xf32>
    %c0_3 = arith.constant 0 : index
    %c1 = arith.constant 1 : index
    %2 = vector.load %arg3[%c0_3, %c1] : memref<64x8xf32, #tpu.memory_space<vmem>>, vector<64x1xf32>
    %c0_4 = arith.constant 0 : index
    %c2 = arith.constant 2 : index
    %3 = vector.load %arg3[%c0_4, %c2] : memref<64x8xf32, #tpu.memory_space<vmem>>, vector<64x1xf32>
    %c0_5 = arith.constant 0 : index
    %c3 = arith.constant 3 : index
    %4 = vector.load %arg3[%c0_5, %c3] : memref<64x8xf32, #tpu.memory_space<vmem>>, vector<64x1xf32>
    %c0_6 = arith.constant 0 : index
    %c4 = arith.constant 4 : index
    %5 = vector.load %arg3[%c0_6, %c4] : memref<64x8xf32, #tpu.memory_space<vmem>>, vector<1x1xf32>
    %6 = vector.broadcast %1 : vector<64x1xf32> to vector<64x512xf32>
    %7 = vector.broadcast %0 : vector<1x512xf32> to vector<64x512xf32>
    %8 = arith.mulf %6, %7 : vector<64x512xf32>
    %9 = vector.broadcast %2 : vector<64x1xf32> to vector<64x512xf32>
    %10 = arith.addf %8, %9 : vector<64x512xf32>
    %cst = arith.constant 0.000000e+00 : f32
    %11 = vector.broadcast %cst : f32 to vector<64x512xf32>
    %12 = arith.maximumf %10, %11 : vector<64x512xf32>
    %c0_7 = arith.constant 0 : index
    %c0_8 = arith.constant 0 : index
    %13 = vector.load %arg2[%c0_7, %c0_8] : memref<64x64xbf16, #tpu.memory_space<vmem>>, vector<64x64xbf16>
    %14 = arith.truncf %12 : vector<64x512xf32> to vector<64x512xbf16>
    %cst_9 = arith.constant dense<0.000000e+00> : vector<64x512xf32>
    %15 = tpu.matmul %13, %14, %cst_9 {dimension_numbers = #tpu.dot_dimension_numbers<[1], [0], [0], [1], [0, 0, 1, 1], [], []>} : vector<64x64xbf16>, vector<64x512xbf16>, vector<64x512xf32> -> vector<64x512xf32>
    %16 = vector.broadcast %3 : vector<64x1xf32> to vector<64x512xf32>
    %17 = arith.addf %15, %16 : vector<64x512xf32>
    %cst_10 = arith.constant 0.000000e+00 : f32
    %18 = vector.broadcast %cst_10 : f32 to vector<64x512xf32>
    %19 = arith.maximumf %17, %18 : vector<64x512xf32>
    %20 = vector.broadcast %4 : vector<64x1xf32> to vector<64x512xf32>
    %21 = arith.mulf %20, %19 : vector<64x512xf32>
    %cst_11 = arith.constant dense<0.000000e+00> : vector<512xf32>
    %22 = vector.multi_reduction <add>, %21, %cst_11 [0] : vector<64x512xf32> to vector<512xf32>
    %23 = vector.shape_cast %22 : vector<512xf32> to vector<1x512xf32>
    %24 = vector.broadcast %5 : vector<1x1xf32> to vector<1x512xf32>
    %25 = arith.addf %23, %24 : vector<1x512xf32>
    %c0_12 = arith.constant 0 : index
    %c0_13 = arith.constant 0 : index
    %26 = vector.load %arg4[%c0_12, %c0_13] : memref<1x512xf32, #tpu.memory_space<vmem>>, vector<1x512xf32>
    tpu.vector_store %arg4[%c0_12, %c0_13], %25 {strides = array<i32>} : memref<1x512xf32, #tpu.memory_space<vmem>>, vector<1x512xf32>,
    return
  }
  func.func @transform_0(%arg0: i32) -> (i32, i32) {
    %c0_i32 = arith.constant 0 : i32
    %c0_i32_0 = arith.constant 0 : i32
    return %c0_i32, %arg0 : i32, i32
  }
  func.func @transform_1(%arg0: i32) -> (i32, i32) {
    %c0_i32 = arith.constant 0 : i32
    %c0_i32_0 = arith.constant 0 : i32
    %c0_i32_1 = arith.constant 0 : i32
    return %c0_i32, %c0_i32_0 : i32, i32
  }
  func.func @transform_2(%arg0: i32) -> (i32, i32) {
    %c0_i32 = arith.constant 0 : i32
    %c0_i32_0 = arith.constant 0 : i32
    %c0_i32_1 = arith.constant 0 : i32
    return %c0_i32, %c0_i32_0 : i32, i32
  }
  func.func @transform_3(%arg0: i32) -> (i32, i32) {
    %c0_i32 = arith.constant 0 : i32
    %c0_i32_0 = arith.constant 0 : i32
    return %c0_i32, %arg0 : i32, i32
  }
}

</mosaic_0001>

<bundles_post_ra>
// kernel: squarenet_forward.1
= control target key start
LH: loop header
LB: loop body
LE: loop exit
PB: predicated region body
PF: predicated region fallthrough
CT: control target
= control target key end

     0   :  { %8 = vsyncpa [#allocation3], 0  ;;  %s1297_s0 = inlined_call_operand.vmem [shape: f32[1,1000], index: 0, kind: input, shape index: {}]   ;;  %s1298_s1 = inlined_call_operand.vmem [shape: bf16[64,64], index: 1, kind: input, shape index: {}]   ;;  %s1299_s2 = inlined_call_operand.vmem [shape: f32[64,8], index: 2, kind: input, shape index: {}]   ;;  %s1300_s3 = inlined_call_operand.hbm [shape: f32[1,1000], index: 3, kind: output, shape index: {}]  }
   0x1   :  { %10 = vsyncpa [#allocation3 + $0x1], 0  ;;  %s1048_s12 = smov 0   ;;  %s1050_s13 = smov 0  }
   0x2   :  { %s1052_s14 = smov 0   ;;  %s1054_s15 = smov 0  }
   0x3 LB: > { %s1069_s16 = sadd.s32 4294967295, %s1019_s15   ;;  %s866_s17 = sadd.s32 4294967294, %s1019_s15   ;;  %s1019_s15 = sphi %s1054_s15, %s1306_s15   ;;  %s1015_s14 = sphi %s1052_s14, %s1305_s14   ;;  %s1011_s13 = sphi %s1050_s13, %s1304_s13   ;;  %s1007_s12 = sphi %s1048_s12, %s1303_s12  }
   0x4   : > { %s1073_s18 = sadd.s32 1, %s1019_s15   ;;  %s91_s19 = sadd.s32 1, %s1015_s14 }
   0x5   : > { %s88_s20 = ssub.s32 %s1019_s15, %s1073_s18  ;;  %p101_p0 = scmp.ne.s32.totalorder %s1015_s14, %s1011_s13 }
   0x6   : > { %p89_p1 = scmp.eq.s32.totalorder %s88_s20, 0  ;;  %p102_p2 = scmp.eq.s32.totalorder %s1069_s16, 1 }
   0x7   : > { %p107_p3 = scmp.ne.s32.totalorder %s1011_s13, %s1007_s12  ;;  %p108_p4 = scmp.eq.s32.totalorder %s866_s17, 1 }
   0x8   : > { %s1084_s21 = scalar_select %p89_p1, %s1015_s14, %s91_s19  }
   0x9   : > { %p1086_p5 = por %p102_p2, %p101_p0  ;;  %p1090_p6 = por %p108_p4, %p107_p3 }
   0xa   : > { %p869_p7 = scmp.ge.s32.totalorder %s1019_s15, 1  ;;  %p140_p8 = scmp.lt.s32.totalorder %s1019_s15, 3 }
   0xc   : > { %p141_p9 = pnand %p869_p7, %p140_p8 }
   0xd   : > { %v173_v0 = vld [vmem:[%s1299_s2 + $0x10] sm:$0xff] (!%p141_p9)  ;;  %v171_v1 = vld [vmem:[%s1299_s2] sm:$0xff] (!%p141_p9)  ;;  %v1021_v2 = vmov (!%p141_p9), 1   ;;  %v172_v3 = vld [vmem:[%s1299_s2 + $0x8] sm:$0xff] (!%p141_p9)  ;;  %v1022_v4 = vmov (!%p141_p9), 0   ;;  %v1023_v10 = vmov (!%p141_p9), 2   ;;  %v221_v14 = vlaneseq (!%p141_p9) }
   0xe   : > { %144 = sbr.rel (%p141_p9) target bundleno = 474 (0x1da), region = 32  ;;  %937 = vset.pattern.permute.xlu0 (!%p141_p9), %v1021_v2  ;;  %935 = vset.pattern.permute.xlu1 (!%p141_p9), %v1021_v2  ;;  %v174_v5 = vld [vmem:[%s1299_s2 + $0x18] sm:$0xff] (!%p141_p9)  ;;  %v176_v6 = vld [vmem:[%s1299_s2 + $0x28] sm:$0xff] (!%p141_p9)  ;;  %v175_v7 = vld [vmem:[%s1299_s2 + $0x20] sm:$0xff] (!%p141_p9)  ;;  %v1024_v11 = vmov (!%p141_p9), 3   ;;  %v1025_v12 = vmov (!%p141_p9), 4  }
   0xf   : > { %282 = vperm.xlu0 (!%p141_p9), %937, %v173_v0   ;;  %274 = vperm.xlu1 (!%p141_p9), %935, %v171_v1   ;;  %v177_v8 = vld [vmem:[%s1299_s2 + $0x30] sm:$0xff] (!%p141_p9)  ;;  %v178_v9 = vld [vmem:[%s1299_s2 + $0x38] sm:$0xff] (!%p141_p9)  ;;  %v179_v13 = vld [vmem:[%s1299_s2] sm:$0x1] (!%p141_p9)  ;;  %s871_s24 = sshll.u32 (!%p141_p9), %s1069_s16, 2  ;;  %v1131_v15 = vshrl.u32 (!%p141_p9), %v221_v14, 7 }
  0x10   : > { %490 = vmatprep.mubr.bf16.mxu0 (!%p141_p9), %v1022_v4  ;;  %563 = vmatprep.mubr.bf16.mxu1 (!%p141_p9), %v1022_v4  ;;  %p164_p10 = scmp.lt.s32.totalorder (!%p141_p9), %s871_s24, 7  ;;  %vm445_vm0 = vcmask (!%p141_p9), 523264   ;;  %s160_s9 = sand.u32 (!%p141_p9), 1, %s1011_s13   ;;  %vm792_vm1 = vcmp.lt.s32.totalorder (!%p141_p9), %v221_v14, 512 }
  0x11   : > { %v227_v16 = vsub.s32 (!%p141_p9), 1, %v1131_v15  ;;  %v223_v19 = vsub.s32 (!%p141_p9), 0, %v1131_v15  ;;  %v235_v21 = vsub.s32 (!%p141_p9), 3, %v1131_v15  ;;  %v231_v22 = vsub.s32 (!%p141_p9), 2, %v1131_v15  ;;  %s870_s10 = sshll.u32 (!%p141_p9), %s160_s9, 2  ;;  %s889_s11 = sshll.u32 (!%p141_p9), %s1069_s16, 6 }
  0x12   : > { %s162_s17 = scalar_lea.vmem (!%p141_p9), [#allocation2], %s870_s10  ;;  %s1255_s25 = scalar_lea.hbm (!%p141_p9), %s1300_s3, %s889_s11 }
  0x13   : > { %938 = vset.pattern.permute.xlu0 (!%p141_p9), %v1022_v4  ;;  %278 = vperm.xlu1 (!%p141_p9), %935, %v172_v3   ;;  %s810_s19 = sshll.u32 (!%p141_p9), %s162_s17, 4  ;;  %s796_s26 = scalar_lea.sflag (!%p141_p9), [#allocation3], %s160_s9  ;;  %s1257_s19 = int_to_ptr.vmem [resolvable:$true] %s810_s19 }
  0x14   : > { %182 = vperm.xlu0 (!%p141_p9), %938, %v171_v1   ;;  %s1027_s16 = smov (!%p141_p9), [#allocation2]  }
  0x15   : > { %s1308_s24 = smov (!%p164_p10, %s871_s24), 7  ;;  %s961_s28 = sshll.u32 %s1027_s16, 4  ;;  %s962_s28 = int_to_ptr.vmem [resolvable:$false] %s961_s28 }
  0x16   : > { %s166_s27 = scalar_lea.vmem %s1297_s0, %s1308_s24  ;;  %s963_s29 = scalar_lea.vmem %s962_s28, 128 }
  0x17   : > { %936 = vset.pattern.permute.xlu1 %v1022_v4  ;;  %v170_v20 = vld [vmem:[%s166_s27] sm:$0xf]  ;;  %s957_s27 = scalar_lea.vmem %s1257_s19, 64  ;;  %p964_p0 = scmp.lt.s32.totalorder %s1257_s19, %s962_s28 }
  0x18   : > { %187 = vperm.xlu0 %938, %v172_v3   ;;  %197 = vperm.xlu1 %936, %v174_v5   ;;  %v1142_v23 = vrot.slane %v170_v20, %v227_v16  ;;  %v1144_v25 = vrot.slane %v170_v20, %v223_v19  ;;  %v1146_v26 = vrot.slane %v170_v20, %v235_v21  ;;  %p958_p11 = scmp.ne.s32.totalorder %s1257_s19, %s957_s27  ;;  %p965_p1 = scmp.lt.s32.totalorder %s963_s29, %s957_s27 }
  0x19   : > { %v1148_v28 = vrot.slane %v170_v20, %v231_v22 }
  0x1a   : > { %p959_p12 = pnand %p958_p11, %p1086_p5  ;;  %p966_p2 = por %p965_p1, %p964_p0 }
  0x1c   : > { %192 = vperm.xlu0 %938, %v173_v0   ;;  %939 = vset.pattern.permute.xlu1 %v1021_v2  ;;  %p960_p13 = pneg %p959_p12 }
  0x1d   : > { %286 = vperm.xlu1 %939, %v174_v5  }
  0x1e   : > { %p967_p3 = pnand %p966_p2, %p960_p13 }
  0x20   : > { %207 = vperm.xlu0 %938, %v176_v6  }
  0x21   : > { %940 = vset.pattern.permute.xlu1 %v1022_v4 }
  0x22   : > { %202 = vperm.xlu1 %940, %v175_v7  }
  0x24   : > { %212 = vperm.xlu0 %938, %v177_v8  }
  0x26   : > { %941 = vset.pattern.permute.xlu1 %v1021_v2 }
  0x27   : > { %290 = vperm.xlu1 %941, %v175_v7  }
  0x28   : > { %943 = vset.pattern.permute.xlu0 %v1021_v2 }
  0x29   : > { %298 = vperm.xlu0 %943, %v177_v8  }
  0x2b   : > { %294 = vperm.xlu1 %941, %v176_v6  }
  0x2d   : > { %946 = vset.pattern.permute.xlu0 %v1023_v10 }
  0x2e   : > { %398 = vperm.xlu0 %946, %v172_v3  }
  0x2f   : > { %942 = vset.pattern.permute.xlu1 %v1022_v4 }
  0x30   : > { %217 = vperm.xlu1 %942, %v178_v9  }
  0x32   : > { %947 = vset.pattern.permute.xlu0 %v1024_v11 }
  0x33   : > { %637 = vperm.xlu0 %947, %v171_v1  }
  0x34   : > { %944 = vset.pattern.permute.xlu1 %v1021_v2 }
  0x35   : > { %302 = vperm.xlu1 %944, %v178_v9  }
  0x37   : > { %645 = vperm.xlu0 %947, %v173_v0  }
  0x39   : > { %945 = vset.pattern.permute.xlu1 %v1023_v10 }
  0x3a   : > { %394 = vperm.xlu1 %945, %v171_v1  }
  0x3b   : > { %649 = vperm.xlu0 %947, %v174_v5  }
  0x3e   : > { %402 = vperm.xlu1 %945, %v173_v0  }
  0x3f   : > { %653 = vperm.xlu0 %947, %v175_v7  }
  0x42   : > { %406 = vperm.xlu1 %945, %v174_v5  }
  0x43   : > { %657 = vperm.xlu0 %947, %v176_v6  }
  0x46   : > { %948 = vset.pattern.permute.xlu1 %v1024_v11 }
  0x47   : > { %641 = vperm.xlu1 %948, %v172_v3   ;;  %665 = vperm.xlu0 %947, %v178_v9  }
  0x4b   : > { %949 = vset.pattern.permute.xlu1 %v1023_v10  ;;  %952 = vset.pattern.permute.xlu0 %v1025_v12 }
  0x4c   : > { %410 = vperm.xlu1 %949, %v175_v7  }
  0x50   : > { %414 = vperm.xlu1 %949, %v176_v6  }
  0x54   : > { %418 = vperm.xlu1 %949, %v177_v8  }
  0x58   : > { %422 = vperm.xlu1 %949, %v178_v9  }
  0x5c   : > { %950 = vset.pattern.permute.xlu1 %v1024_v11 }
  0x5d   : > { %661 = vperm.xlu1 %950, %v177_v8  }
  0x61   : > { %951 = vset.pattern.permute.xlu1 %v1025_v12 }
  0x62   : > { %754 = vperm.xlu1 %951, %v179_v13  }
  0x8e   : > { %v275_v17 = vpop.permute.xlu1 %274  ;;  %v1137_v18 = vpop.permute.xlu0 %282 }
  0x92   : > { %v279_v24 = vpop.permute.xlu1 %278 }
  0x93   : > { %v183_v27 = vpop.permute.xlu0 %182 }
  0x94   : > { %v242_v29 = vmul.f32 %v1142_v23, %v183_v27  ;;  %v241_v30 = vmul.f32 %v1144_v25, %v183_v27  ;;  %v244_v31 = vmul.f32 %v1146_v26, %v183_v27  ;;  %v243_v34 = vmul.f32 %v1148_v28, %v183_v27 }
  0x96   : > { %v306_v38 = vadd.f32 %v275_v17, %v242_v29  ;;  %v308_v40 = vadd.f32 %v275_v17, %v244_v31  ;;  %v305_v41 = vadd.f32 %v275_v17, %v241_v30  ;;  %v307_v52 = vadd.f32 %v275_v17, %v243_v34 }
  0x97   : > { %v188_v32 = vpop.permute.xlu0 %187  ;;  %v198_v33 = vpop.permute.xlu1 %197 }
  0x98   : > { %v245_v35 = vmul.f32 %v1144_v25, %v188_v32  ;;  %v247_v36 = vmul.f32 %v1148_v28, %v188_v32  ;;  %v246_v37 = vmul.f32 %v1142_v23, %v188_v32  ;;  %v248_v39 = vmul.f32 %v1146_v26, %v188_v32 }
  0x99   : > { %v254_v43 = vmul.f32 %v1142_v23, %v198_v33  ;;  %v256_v44 = vmul.f32 %v1146_v26, %v198_v33  ;;  %v253_v48 = vmul.f32 %v1144_v25, %v198_v33  ;;  %v255_v53 = vmul.f32 %v1148_v28, %v198_v33 }
  0x9a   : > { %v309_v42 = vadd.f32 %v279_v24, %v245_v35  ;;  %v310_v46 = vadd.f32 %v279_v24, %v246_v37  ;;  %v311_v47 = vadd.f32 %v279_v24, %v247_v36  ;;  %v338_v56 = vmax.f32 %v306_v38, 0.0 }
  0x9b   : > { %v193_v45 = vpop.permute.xlu0 %192  ;;  %v312_v58 = vadd.f32 %v279_v24, %v248_v39  ;;  %v337_v62 = vmax.f32 %v305_v41, 0.0  ;;  %v340_v2 = vmax.f32 %v308_v40, 0.0  ;;  %v339_v3 = vmax.f32 %v307_v52, 0.0 }
  0x9c   : > { %v250_v49 = vmul.f32 %v1142_v23, %v193_v45  ;;  %v252_v50 = vmul.f32 %v1146_v26, %v193_v45  ;;  %v287_v51 = vpop.permute.xlu1 %286  ;;  %v342_v57 = vmax.f32 %v310_v46, 0.0  ;;  %v341_v59 = vmax.f32 %v309_v42, 0.0 }
  0x9d   : > { %v318_v54 = vadd.f32 %v287_v51, %v254_v43  ;;  %v320_v55 = vadd.f32 %v287_v51, %v256_v44  ;;  %v343_v60 = vmax.f32 %v311_v47, 0.0  ;;  %v249_v61 = vmul.f32 %v1144_v25, %v193_v45 }
  0x9e   : > { %v314_v63 = vadd.f32 %v1137_v18, %v250_v49  ;;  %v316_v0 = vadd.f32 %v1137_v18, %v252_v50  ;;  %v317_v1 = vadd.f32 %v287_v51, %v253_v48  ;;  %v378_v6 = vpack.c.bf16 %v342_v57, %v338_v56 }
  0x9f   : > { %v350_v5 = vmax.f32 %v318_v54, 0.0  ;;  %v344_v7 = vmax.f32 %v312_v58, 0.0  ;;  %v377_v9 = vpack.c.bf16 %v341_v59, %v337_v62  ;;  %v352_v10 = vmax.f32 %v320_v55, 0.0  ;;  %v208_v13 = vpop.permute.xlu0 %207 }
  0xa0   : > { %v251_v11 = vmul.f32 %v1148_v28, %v193_v45  ;;  %v319_v12 = vadd.f32 %v287_v51, %v255_v53  ;;  %v379_v16 = vpack.c.bf16 %v343_v60, %v339_v3  ;;  %458 = vmatprep.subr.bf16.mxu0 %v378_v6  ;;  %v346_v19 = vmax.f32 %v314_v63, 0.0 }
  0xa1   : > { %v203_v8 = vpop.permute.xlu1 %202  ;;  %v380_v17 = vpack.c.bf16 %v344_v7, %v340_v2  ;;  %v348_v20 = vmax.f32 %v316_v0, 0.0  ;;  %v313_v21 = vadd.f32 %v1137_v18, %v249_v61  ;;  %459 = vmatpush1.bf16.msra.mxu0 %v377_v9  ;;  %v349_v31 = vmax.f32 %v317_v1, 0.0 }
  0xa2   : > { %v257_v22 = vmul.f32 %v1144_v25, %v203_v8  ;;  %v258_v24 = vmul.f32 %v1142_v23, %v203_v8  ;;  %v382_v27 = vpack.c.bf16 %v350_v5, %v346_v19  ;;  %v259_v32 = vmul.f32 %v1148_v28, %v203_v8 }
  0xa3   : > { %531 = vmatprep.subr.bf16.mxu1 %v380_v17  ;;  %v384_v29 = vpack.c.bf16 %v352_v10, %v348_v20  ;;  %v345_v30 = vmax.f32 %v313_v21, 0.0  ;;  %v260_v33 = vmul.f32 %v1146_v26, %v203_v8  ;;  %v315_v34 = vadd.f32 %v1137_v18, %v251_v11  ;;  %v213_v39 = vpop.permute.xlu0 %212 }
  0xa4   : > { %532 = vmatpush1.bf16.msra.mxu1 %v379_v16  ;;  %v351_v35 = vmax.f32 %v319_v12, 0.0  ;;  %460 = vmatprep.subr.bf16.mxu0 %v382_v27  ;;  %v261_v44 = vmul.f32 %v1144_v25, %v208_v13  ;;  %v262_v45 = vmul.f32 %v1142_v23, %v208_v13  ;;  %v263_v46 = vmul.f32 %v1148_v28, %v208_v13 }
  0xa5   : > { %533 = vmatprep.subr.bf16.mxu1 %v384_v29  ;;  %v381_v37 = vpack.c.bf16 %v349_v31, %v345_v30  ;;  %v347_v40 = vmax.f32 %v315_v34, 0.0  ;;  %v264_v47 = vmul.f32 %v1146_v26, %v208_v13  ;;  %v265_v61 = vmul.f32 %v1144_v25, %v213_v39 }
  0xa6   : > { %v291_v36 = vpop.permute.xlu1 %290  ;;  %v266_v5 = vmul.f32 %v1142_v23, %v213_v39  ;;  %v267_v6 = vmul.f32 %v1148_v28, %v213_v39  ;;  %v268_v7 = vmul.f32 %v1146_v26, %v213_v39  ;;  %v956_v39 = vld [vmem:[%s1298_s1 + $0x18] sm:$0xff]  }
  0xa7   : > { %v321_v38 = vadd.f32 %v291_v36, %v257_v22  ;;  %v322_v41 = vadd.f32 %v291_v36, %v258_v24  ;;  %v323_v42 = vadd.f32 %v291_v36, %v259_v32  ;;  %v324_v43 = vadd.f32 %v291_v36, %v260_v33  ;;  %461 = vmatpush1.bf16.msra.mxu0 %v381_v37 }
  0xa8   : > { %v383_v18 = vpack.c.bf16 %v351_v35, %v347_v40  ;;  %v299_v62 = vpop.permute.xlu0 %298 }
  0xa9   : > { %v354_v53 = vmax.f32 %v322_v41, 0.0  ;;  %v356_v54 = vmax.f32 %v324_v43, 0.0  ;;  %v353_v55 = vmax.f32 %v321_v38, 0.0  ;;  %v355_v56 = vmax.f32 %v323_v42, 0.0  ;;  %v955_v38 = vld [vmem:[%s1298_s1 + $0x10] sm:$0xff]  }
  0xaa   : > { %v295_v48 = vpop.permute.xlu1 %294  ;;  %534 = vmatpush1.bf16.msra.mxu1 %v383_v18  ;;  %v329_v8 = vadd.f32 %v299_v62, %v265_v61  ;;  %v330_v9 = vadd.f32 %v299_v62, %v266_v5  ;;  %v331_v10 = vadd.f32 %v299_v62, %v267_v6  ;;  %v332_v11 = vadd.f32 %v299_v62, %v268_v7 }
  0xab   : > { %v325_v49 = vadd.f32 %v295_v48, %v261_v44  ;;  %v326_v50 = vadd.f32 %v295_v48, %v262_v45  ;;  %v327_v51 = vadd.f32 %v295_v48, %v263_v46  ;;  %v328_v52 = vadd.f32 %v295_v48, %v264_v47 }
  0xac   : > { %v362_v27 = vmax.f32 %v330_v9, 0.0  ;;  %v364_v29 = vmax.f32 %v332_v11, 0.0  ;;  %v361_v30 = vmax.f32 %v329_v8, 0.0  ;;  %v363_v31 = vmax.f32 %v331_v10, 0.0 }
  0xad   : > { %v358_v57 = vmax.f32 %v326_v50, 0.0  ;;  %v360_v58 = vmax.f32 %v328_v52, 0.0  ;;  %v357_v59 = vmax.f32 %v325_v49, 0.0  ;;  %v359_v60 = vmax.f32 %v327_v51, 0.0  ;;  %v399_v43 = vpop.permute.xlu0 %398 }
  0xaf   : > { %v218_v63 = vpop.permute.xlu1 %217  ;;  %v386_v0 = vpack.c.bf16 %v358_v57, %v354_v53  ;;  %v388_v1 = vpack.c.bf16 %v360_v58, %v356_v54  ;;  %v385_v2 = vpack.c.bf16 %v357_v59, %v353_v55  ;;  %v387_v3 = vpack.c.bf16 %v359_v60, %v355_v56 }
  0xb0   : > { %v269_v12 = vmul.f32 %v1144_v25, %v218_v63  ;;  %v270_v13 = vmul.f32 %v1142_v23, %v218_v63  ;;  %v271_v16 = vmul.f32 %v1148_v28, %v218_v63  ;;  %v272_v17 = vmul.f32 %v1146_v26, %v218_v63  ;;  %v953_v26 = vld [vmem:[%s1298_s1] sm:$0xff]   ;;  %v954_v28 = vld [vmem:[%s1298_s1 + $0x8] sm:$0xff]  }
  0xb1   : > { %462 = vmatprep.subr.bf16.mxu0 %v386_v0  ;;  %535 = vmatprep.subr.bf16.mxu1 %v388_v1 }
  0xb2   : > { %463 = vmatpush1.bf16.msra.mxu0 %v385_v2  ;;  %536 = vmatpush1.bf16.msra.mxu1 %v387_v3  ;;  %v638_v45 = vpop.permute.xlu0 %637 }
  0xb4   : > { %v303_v19 = vpop.permute.xlu1 %302 }
  0xb5   : > { %v333_v20 = vadd.f32 %v303_v19, %v269_v12  ;;  %v334_v21 = vadd.f32 %v303_v19, %v270_v13  ;;  %v335_v22 = vadd.f32 %v303_v19, %v271_v16  ;;  %v336_v24 = vadd.f32 %v303_v19, %v272_v17 }
  0xb6   : > { %v1216_v47 = vpop.permute.xlu0 %645 }
  0xb7   : > { %v366_v32 = vmax.f32 %v334_v21, 0.0  ;;  %v368_v33 = vmax.f32 %v336_v24, 0.0  ;;  %v365_v34 = vmax.f32 %v333_v20, 0.0  ;;  %v367_v35 = vmax.f32 %v335_v22, 0.0 }
  0xb9   : > { %v390_v25 = vpack.c.bf16 %v366_v32, %v362_v27  ;;  %v392_v36 = vpack.c.bf16 %v368_v33, %v364_v29  ;;  %v389_v23 = vpack.c.bf16 %v365_v34, %v361_v30  ;;  %v391_v37 = vpack.c.bf16 %v367_v35, %v363_v31  ;;  %v395_v40 = vpop.permute.xlu1 %394 }
  0xba   : > { %v650_v8 = vpop.permute.xlu0 %649 }
  0xbb   : > { %464 = vmatprep.subr.bf16.mxu0 %v390_v25  ;;  %537 = vmatprep.subr.bf16.mxu1 %v392_v36 }
  0xbc   : > { %465 = vmatpush1.bf16.msra.mxu0 %v389_v23  ;;  %538 = vmatpush1.bf16.msra.mxu1 %v391_v37 }
  0xbd   : > { %v403_v41 = vpop.permute.xlu1 %402 }
  0xbf   : > { %876 = vmatmul.mubr.msk.bf16.vlgmr.msra.gmra.mrb[0].mxu0 %vm445_vm0, %v953_v26  ;;  %880 = vmatmul.mubr.msk.bf16.vlgmr.msra.gmra.mrb[0].mxu1 %vm445_vm0, %v953_v26 }
  0xc0   : > { %500 = vmatprep.mubr.bf16.mxu0 %v1022_v4  ;;  %573 = vmatprep.mubr.bf16.mxu1 %v1022_v4 }
  0xc1   : > { %v1212_v42 = vpop.permute.xlu1 %406 }
  0xc6   : > { %v642_v44 = vpop.permute.xlu1 %641 }
  0xc7   : > { %877 = vmatmul.mubr.msk.bf16.gmra.mrb[4].mxu0 %vm445_vm0, %v954_v28  ;;  %881 = vmatmul.mubr.msk.bf16.gmra.mrb[4].mxu1 %vm445_vm0, %v954_v28 }
  0xc8   : > { %510 = vmatprep.mubr.bf16.mxu0 %v1022_v4  ;;  %583 = vmatprep.mubr.bf16.mxu1 %v1022_v4 }
  0xcb   : > { %v1214_v46 = vpop.permute.xlu1 %410 }
  0xcf   : > { %878 = vmatmul.mubr.msk.bf16.gmra.mrb[8].mxu0 %vm445_vm0, %v955_v38  ;;  %882 = vmatmul.mubr.msk.bf16.gmra.mrb[8].mxu1 %vm445_vm0, %v955_v38 }
  0xd0   : > { %520 = vmatprep.mubr.bf16.mxu0 %v1022_v4  ;;  %593 = vmatprep.mubr.bf16.mxu1 %v1022_v4  ;;  %v1218_v4 = vpop.permute.xlu1 %414 }
  0xd4   : > { %v1220_v13 = vpop.permute.xlu1 %418 }
  0xd7   : > { %879 = vmatmul.mubr.msk.bf16.gmra.mrb[12].mxu0 %vm445_vm0, %v956_v39  ;;  %883 = vmatmul.mubr.msk.bf16.gmra.mrb[12].mxu1 %vm445_vm0, %v956_v39 }
 0x192   : > { %v492_v18 = vpop.f32.mrb[0].mxu0  ;;  %v565_v48 = vpop.f32.mrb[0].mxu1 }
 0x193   : > { %v493_v49 = vadd.f32 %v492_v18, %v395_v40  ;;  %v566_v50 = vadd.f32 %v565_v48, %v395_v40  ;;  %v494_v51 = vpop.f32.mrb[1].mxu0  ;;  %v567_v52 = vpop.f32.mrb[1].mxu1 }
 0x194   : > { %v495_v53 = vadd.f32 %v494_v51, %v395_v40  ;;  %v568_v54 = vadd.f32 %v567_v52, %v395_v40  ;;  %v496_v55 = vpop.f32.mrb[2].mxu0  ;;  %v569_v56 = vpop.f32.mrb[2].mxu1 }
 0x195   : > { %v604_v57 = vmax.f32 %v493_v49, 0.0  ;;  %v606_v58 = vmax.f32 %v566_v50, 0.0  ;;  %v497_v59 = vadd.f32 %v496_v55, %v399_v43  ;;  %v570_v60 = vadd.f32 %v569_v56, %v399_v43  ;;  %v498_v61 = vpop.f32.mrb[3].mxu0  ;;  %v571_v62 = vpop.f32.mrb[3].mxu1 }
 0x196   : > { %v605_v63 = vmax.f32 %v495_v53, 0.0  ;;  %v607_v0 = vmax.f32 %v568_v54, 0.0  ;;  %v499_v1 = vadd.f32 %v498_v61, %v399_v43  ;;  %v572_v2 = vadd.f32 %v571_v62, %v399_v43  ;;  %v654_v55 = vpop.permute.xlu0 %653 }
 0x197   : > { %v608_v3 = vmax.f32 %v497_v59, 0.0  ;;  %v610_v5 = vmax.f32 %v570_v60, 0.0  ;;  %v668_v9 = vmul.f32 %v638_v45, %v604_v57  ;;  %v670_v10 = vmul.f32 %v638_v45, %v606_v58  ;;  %v1230_v60 = vpop.permute.xlu1 %422 }
 0x198   : > { %v609_v6 = vmax.f32 %v499_v1, 0.0  ;;  %v611_v7 = vmax.f32 %v572_v2, 0.0  ;;  %v669_v16 = vmul.f32 %v638_v45, %v605_v63  ;;  %v671_v17 = vmul.f32 %v638_v45, %v607_v0 }
 0x199   : > { %v672_v11 = vmul.f32 %v642_v44, %v608_v3  ;;  %v674_v12 = vmul.f32 %v642_v44, %v610_v5 }
 0x19a   : > { %v673_v19 = vmul.f32 %v642_v44, %v609_v6  ;;  %v675_v20 = vmul.f32 %v642_v44, %v611_v7  ;;  %v502_v21 = vpop.f32.mrb[4].mxu0  ;;  %v575_v22 = vpop.f32.mrb[4].mxu1 }
 0x19b   : > { %v700_v24 = vadd.f32 %v672_v11, %v668_v9  ;;  %v726_v27 = vadd.f32 %v674_v12, %v670_v10  ;;  %v503_v29 = vadd.f32 %v502_v21, %v403_v41  ;;  %v576_v30 = vadd.f32 %v575_v22, %v403_v41  ;;  %v504_v31 = vpop.f32.mrb[5].mxu0  ;;  %v577_v32 = vpop.f32.mrb[5].mxu1 }
 0x19c   : > { %v713_v33 = vadd.f32 %v673_v19, %v669_v16  ;;  %v739_v34 = vadd.f32 %v675_v20, %v671_v17  ;;  %v505_v35 = vadd.f32 %v504_v31, %v403_v41  ;;  %v578_v25 = vadd.f32 %v577_v32, %v403_v41  ;;  %v506_v36 = vpop.f32.mrb[6].mxu0  ;;  %v579_v23 = vpop.f32.mrb[6].mxu1 }
 0x19d   : > { %v612_v37 = vmax.f32 %v503_v29, 0.0  ;;  %v614_v26 = vmax.f32 %v576_v30, 0.0  ;;  %v507_v28 = vadd.f32 %v506_v36, %v1212_v42  ;;  %v580_v38 = vadd.f32 %v579_v23, %v1212_v42  ;;  %v508_v39 = vpop.f32.mrb[7].mxu0  ;;  %v581_v40 = vpop.f32.mrb[7].mxu1 }
 0x19e   : > { %v613_v43 = vmax.f32 %v505_v35, 0.0  ;;  %v615_v44 = vmax.f32 %v578_v25, 0.0  ;;  %v509_v45 = vadd.f32 %v508_v39, %v1212_v42  ;;  %v582_v18 = vadd.f32 %v581_v40, %v1212_v42  ;;  %v658_v35 = vpop.permute.xlu0 %657  ;;  %v662_v40 = vpop.permute.xlu1 %661 }
 0x19f   : > { %v676_v48 = vmul.f32 %v1216_v47, %v612_v37  ;;  %v678_v41 = vmul.f32 %v1216_v47, %v614_v26  ;;  %v616_v49 = vmax.f32 %v507_v28, 0.0  ;;  %v618_v50 = vmax.f32 %v580_v38, 0.0 }
 0x1a0   : > { %v677_v51 = vmul.f32 %v1216_v47, %v613_v43  ;;  %v679_v52 = vmul.f32 %v1216_v47, %v615_v44  ;;  %v617_v53 = vmax.f32 %v509_v45, 0.0  ;;  %v619_v54 = vmax.f32 %v582_v18, 0.0 }
 0x1a1   : > { %v701_v56 = vadd.f32 %v700_v24, %v676_v48  ;;  %v727_v57 = vadd.f32 %v726_v27, %v678_v41  ;;  %v680_v58 = vmul.f32 %v650_v8, %v616_v49  ;;  %v682_v59 = vmul.f32 %v650_v8, %v618_v50 }
 0x1a2   : > { %v714_v42 = vadd.f32 %v713_v33, %v677_v51  ;;  %v740_v61 = vadd.f32 %v739_v34, %v679_v52  ;;  %v681_v62 = vmul.f32 %v650_v8, %v617_v53  ;;  %v683_v63 = vmul.f32 %v650_v8, %v619_v54  ;;  %v512_v0 = vpop.f32.mrb[8].mxu0  ;;  %v585_v1 = vpop.f32.mrb[8].mxu1 }
 0x1a3   : > { %v702_v2 = vadd.f32 %v701_v56, %v680_v58  ;;  %v728_v3 = vadd.f32 %v727_v57, %v682_v59  ;;  %v513_v5 = vadd.f32 %v512_v0, %v1214_v46  ;;  %v586_v47 = vadd.f32 %v585_v1, %v1214_v46  ;;  %v514_v6 = vpop.f32.mrb[9].mxu0  ;;  %v587_v7 = vpop.f32.mrb[9].mxu1 }
 0x1a4   : > { %v715_v9 = vadd.f32 %v714_v42, %v681_v62  ;;  %v741_v10 = vadd.f32 %v740_v61, %v683_v63  ;;  %v515_v11 = vadd.f32 %v514_v6, %v1214_v46  ;;  %v588_v12 = vadd.f32 %v587_v7, %v1214_v46  ;;  %v516_v16 = vpop.f32.mrb[10].mxu0  ;;  %v589_v17 = vpop.f32.mrb[10].mxu1 }
 0x1a5   : > { %v620_v19 = vmax.f32 %v513_v5, 0.0  ;;  %v622_v8 = vmax.f32 %v586_v47, 0.0  ;;  %v517_v20 = vadd.f32 %v516_v16, %v1218_v4  ;;  %v590_v21 = vadd.f32 %v589_v17, %v1218_v4  ;;  %v518_v22 = vpop.f32.mrb[11].mxu0  ;;  %v591_v24 = vpop.f32.mrb[11].mxu1 }
 0x1a6   : > { %v621_v27 = vmax.f32 %v515_v11, 0.0  ;;  %v623_v29 = vmax.f32 %v588_v12, 0.0  ;;  %v519_v30 = vadd.f32 %v518_v22, %v1218_v4  ;;  %v592_v31 = vadd.f32 %v591_v24, %v1218_v4 }
 0x1a7   : > { %v684_v32 = vmul.f32 %v654_v55, %v620_v19  ;;  %v686_v33 = vmul.f32 %v654_v55, %v622_v8  ;;  %v624_v34 = vmax.f32 %v517_v20, 0.0  ;;  %v626_v46 = vmax.f32 %v590_v21, 0.0 }
 0x1a8   : > { %v685_v25 = vmul.f32 %v654_v55, %v621_v27  ;;  %v687_v36 = vmul.f32 %v654_v55, %v623_v29  ;;  %v625_v23 = vmax.f32 %v519_v30, 0.0  ;;  %v627_v37 = vmax.f32 %v592_v31, 0.0 }
 0x1a9   : > { %v703_v26 = vadd.f32 %v702_v2, %v684_v32  ;;  %v729_v28 = vadd.f32 %v728_v3, %v686_v33  ;;  %v688_v38 = vmul.f32 %v658_v35, %v624_v34  ;;  %v690_v39 = vmul.f32 %v658_v35, %v626_v46 }
 0x1aa   : > { %v716_v43 = vadd.f32 %v715_v9, %v685_v25  ;;  %v742_v44 = vadd.f32 %v741_v10, %v687_v36  ;;  %v689_v45 = vmul.f32 %v658_v35, %v625_v23  ;;  %v691_v18 = vmul.f32 %v658_v35, %v627_v37  ;;  %v522_v48 = vpop.f32.mrb[12].mxu0  ;;  %v595_v4 = vpop.f32.mrb[12].mxu1 }
 0x1ab   : > { %v704_v41 = vadd.f32 %v703_v26, %v688_v38  ;;  %v730_v49 = vadd.f32 %v729_v28, %v690_v39  ;;  %v523_v50 = vadd.f32 %v522_v48, %v1220_v13  ;;  %v596_v51 = vadd.f32 %v595_v4, %v1220_v13  ;;  %v524_v52 = vpop.f32.mrb[13].mxu0  ;;  %v597_v53 = vpop.f32.mrb[13].mxu1 }
 0x1ac   : > { %v717_v54 = vadd.f32 %v716_v43, %v689_v45  ;;  %v743_v55 = vadd.f32 %v742_v44, %v691_v18  ;;  %v525_v56 = vadd.f32 %v524_v52, %v1220_v13  ;;  %v598_v57 = vadd.f32 %v597_v53, %v1220_v13  ;;  %v526_v58 = vpop.f32.mrb[14].mxu0  ;;  %v599_v59 = vpop.f32.mrb[14].mxu1 }
 0x1ad   : > { %v628_v42 = vmax.f32 %v523_v50, 0.0  ;;  %v630_v61 = vmax.f32 %v596_v51, 0.0  ;;  %v527_v62 = vadd.f32 %v526_v58, %v1230_v60  ;;  %v600_v63 = vadd.f32 %v599_v59, %v1230_v60  ;;  %v528_v0 = vpop.f32.mrb[15].mxu0  ;;  %v601_v1 = vpop.f32.mrb[15].mxu1 }
 0x1ae   : > { %v629_v2 = vmax.f32 %v525_v56, 0.0  ;;  %v631_v3 = vmax.f32 %v598_v57, 0.0  ;;  %v529_v5 = vadd.f32 %v528_v0, %v1230_v60  ;;  %v602_v47 = vadd.f32 %v601_v1, %v1230_v60  ;;  %v666_v10 = vpop.permute.xlu0 %665  ;;  %v755_v50 = vpop.permute.xlu1 %754 }
 0x1af   : > { %v632_v6 = vmax.f32 %v527_v62, 0.0  ;;  %v634_v7 = vmax.f32 %v600_v63, 0.0  ;;  %v692_v9 = vmul.f32 %v662_v40, %v628_v42  ;;  %v694_v13 = vmul.f32 %v662_v40, %v630_v61 }
 0x1b0   : > { %v633_v11 = vmax.f32 %v529_v5, 0.0  ;;  %v635_v12 = vmax.f32 %v602_v47, 0.0  ;;  %v693_v16 = vmul.f32 %v662_v40, %v629_v2  ;;  %v695_v17 = vmul.f32 %v662_v40, %v631_v3 }
 0x1b1   : > { %v696_v19 = vmul.f32 %v666_v10, %v632_v6  ;;  %v698_v8 = vmul.f32 %v666_v10, %v634_v7  ;;  %v705_v20 = vadd.f32 %v704_v41, %v692_v9  ;;  %v731_v21 = vadd.f32 %v730_v49, %v694_v13 }
 0x1b2   : > { %v697_v22 = vmul.f32 %v666_v10, %v633_v11  ;;  %v699_v24 = vmul.f32 %v666_v10, %v635_v12  ;;  %v718_v27 = vadd.f32 %v717_v54, %v693_v16  ;;  %v744_v29 = vadd.f32 %v743_v55, %v695_v17 }
 0x1b3   : > { %v706_v30 = vadd.f32 %v705_v20, %v696_v19  ;;  %v732_v31 = vadd.f32 %v731_v21, %v698_v8  ;;  %v1026_v38 = vmov 1966171168  }
 0x1b4   : > { %v719_v60 = vadd.f32 %v718_v27, %v697_v22  ;;  %v745_v32 = vadd.f32 %v744_v29, %v699_v24  ;;  %v768_v39 = vunpack.c.l.s4 %v1026_v38 }
 0x1b5   : > { %v707_v33 = vrot.slane %v706_v30, 4  ;;  %v733_v34 = vrot.slane %v732_v31, 4 }
 0x1b6   : > { %v720_v46 = vrot.slane %v719_v60, 4  ;;  %v746_v35 = vrot.slane %v745_v32, 4  ;;  %v769_v49 = vunpack.c.0.s8 %v768_v39 }
 0x1b7   : > { %v708_v25 = vadd.f32 %v707_v33, %v706_v30  ;;  %v734_v36 = vadd.f32 %v733_v34, %v732_v31 }
 0x1b8   : > { %v721_v23 = vadd.f32 %v720_v46, %v719_v60  ;;  %v747_v37 = vadd.f32 %v746_v35, %v745_v32  ;;  %v772_v59 = vsub.s32 %v769_v49, %v1131_v15 }
 0x1b9   : > { %v709_v26 = vrot.slane %v708_v25, 2  ;;  %v735_v28 = vrot.slane %v734_v36, 2 }
 0x1ba   : > { %v722_v40 = vrot.slane %v721_v23, 2  ;;  %v748_v43 = vrot.slane %v747_v37, 2 }
 0x1bb   : > { %v710_v44 = vadd.f32 %v709_v26, %v708_v25  ;;  %v736_v45 = vadd.f32 %v735_v28, %v734_v36 }
 0x1bc   : > { %v723_v18 = vadd.f32 %v722_v40, %v721_v23  ;;  %v749_v48 = vadd.f32 %v748_v43, %v747_v37 }
 0x1bd   : > { %v711_v4 = vrot.slane %v710_v44, 1  ;;  %v737_v41 = vrot.slane %v736_v45, 1 }
 0x1be   : > { %v724_v51 = vrot.slane %v723_v18, 1  ;;  %v750_v52 = vrot.slane %v749_v48, 1 }
 0x1bf   : > { %v712_v53 = vadd.f32 %v711_v4, %v710_v44  ;;  %v738_v54 = vadd.f32 %v737_v41, %v736_v45 }
 0x1c0   : > { %v725_v55 = vadd.f32 %v724_v51, %v723_v18  ;;  %v751_v56 = vadd.f32 %v750_v52, %v749_v48 }
 0x1c1   : > { %v757_v57 = vadd.f32 %v755_v50, %v712_v53  ;;  %v759_v58 = vadd.f32 %v755_v50, %v738_v54 }
 0x1c2   : > { %v758_v42 = vadd.f32 %v755_v50, %v725_v55  ;;  %v760_v61 = vadd.f32 %v755_v50, %v751_v56 }
 0x1c4   : > { %v765_v62 = vcombine.low %v757_v57, %v758_v42  ;;  %v766_v63 = vcombine.low %v759_v58, %v760_v61 }
 0x1c6   : > { %v773_v0 = vrot.slane %v765_v62, %v772_v59  ;;  %v780_v1 = vrot.slane %v766_v63, %v772_v59 }
 0x1c8   : > { %v781_v2 = vcombine.low %v773_v0, %v780_v1 }
 0x1ca   : > { %v788_v3 = vrot.slane %v781_v2, %v772_v59 }
 0x1cc   : > { %794 = vst.msk [vmem:[%s162_s17] sm:$0xf] %vm792_vm1, %v788_v3 }
 0x1cd   : > { %970 = shalt.err (!%p967_p3)
}
 0x1ce   : > { %s971_s30 = scalar_lea.hbm %s1255_s25, 64  ;;  %s975_s6 = scalar_lea.hbm %s1300_s3, 128 }
 0x1cf   : > { %p972_p4 = scmp.ne.s32.totalorder %s1255_s25, %s971_s30  ;;  %p976_p9 = scmp.lt.u32.totalorder %s1255_s25, %s1300_s3 }
 0x1d0   : > { %p977_p10 = scmp.lt.u32.totalorder %s975_s6, %s971_s30  ;;  %p979_p12 = scmp.lt.u32.totalorder %s971_s30, %s1255_s25 }
 0x1d1   : > { %p973_p7 = pnand %p972_p4, %p1086_p5 }
 0x1d2   : > { %p978_p11 = por %p977_p10, %p976_p9 }
 0x1d3   : > { %p974_p8 = pneg %p973_p7 }
 0x1d4   : > { %p980_p13 = por %p979_p12, %p978_p11 }
 0x1d6   : > { %p981_p0 = pnand %p980_p13, %p974_p8 }
 0x1d8   : > { %984 = shalt.err (!%p981_p0)
}
 0x1d9   : > { %890 = dma.vmem_to_hbm [thread:$0]  (%p1086_p5), %s1257_s19, 64, %s1255_s25, %s796_s26  }
 0x1da PF: > { %p896_p1 = scmp.ge.s32.totalorder %s1019_s15, 2  ;;  %s822_s9 = sand.u32 1, %s1007_s12  }
 0x1db   : > { %s823_s10 = scalar_lea.sflag [#allocation3], %s822_s9 }
 0x1dc   : > { %p893_p2 = pnand %p896_p1, %p1090_p6 }
 0x1de   : > { %1002 = dma.done.wait (!%p893_p2), %s823_s10, 64  }
 0x1df   : > { %1004 = vsyncadd (!%p893_p2), %s823_s10, 4294967232  ;;  %p13_p3 = scmp.ge.s32.totalorder %s1073_s18, 4   ;;  %s1303_s12 = smov %s1011_s13 }
 0x1e0   : > { %s1304_s13 = smov %s1015_s14  ;;  %s1305_s14 = smov %s1084_s21 }
 0x1e1   : > { %s1306_s15 = smov %s1073_s18  ;;  %15 = sbr.rel (!%p13_p3) target bundleno = 3 (0x3), region = 67 }
 0x1e8   :  { %828 = vsyncpa [#allocation3], 1 }
 0x1e9   :  { %830 = vsyncpa [#allocation3 + $0x1], 1 }

</bundles_post_ra>
